<compile_context>
chip_gen: v7x
topology: tpu7x:2x2x1
jax: 0.10.0
libtpu: 0.0.40
codegen_flags: <defaults>
</compile_context>

<pallas_src>
import math

import jax
import jax.numpy as jnp
from jax.experimental import pallas as pl
from jax.experimental.pallas import tpu as pltpu


_LANE = 128                # lane-dense last dim (unmasked vst)
_MAX_BLOCK_ROWS = 4096     # 4096 * 128 * 4 B = 2 MiB per f32 input block


def _rel_root_depth_loss_kernel(out_ref, gt_ref, valid_ref, loss_ref):
    # Elementwise hot path: abs-diff gated by validity (VPU only).
    diff = jnp.abs(out_ref[...] - gt_ref[...])
    loss_ref[...] = diff * valid_ref[...].astype(loss_ref.dtype)


def rel_root_depth_loss(root_depth_out, root_depth_gt, root_valid):
    """|out - gt| * valid, elementwise, via a Pallas TPU kernel.

    Accepts any (matching) input shape; returns the same shape with the dtype
    of `root_depth_out`.  `root_valid` may be bool / int / float.
    """
    assert root_depth_out.shape == root_depth_gt.shape == root_valid.shape
    orig_shape = root_depth_out.shape
    dtype = root_depth_out.dtype

    # Ship boolean masks as int8 (1 byte) to cut HBM traffic; keep float /
    # wider masks as-is so non-binary weights preserve exact semantics.
    if root_valid.dtype == jnp.bool_:
        root_valid = root_valid.astype(jnp.int8)

    total = math.prod(orig_shape)
    padded = pl.cdiv(total, _LANE) * _LANE
    rows = padded // _LANE

    def _flat(x):
        x = x.reshape(-1)
        if padded != total:
            x = jnp.pad(x, (0, padded - total))
        return x.reshape(rows, _LANE)

    out2 = _flat(root_depth_out)
    gt2 = _flat(root_depth_gt.astype(dtype))
    valid2 = _flat(root_valid)

    # Big lane-dense blocks; single block when the whole array is small.
    block_rows = rows if rows <= _MAX_BLOCK_ROWS else _MAX_BLOCK_ROWS
    grid = (pl.cdiv(rows, block_rows),)

    def _spec():
        return pl.BlockSpec((block_rows, _LANE), lambda i: (i, 0))

    # Explicit VMEM budget: all four streams, double-buffered, plus headroom.
    block_bytes = block_rows * _LANE * (
        2 * jnp.dtype(dtype).itemsize                 # depth_out + loss output
        + jnp.dtype(gt2.dtype).itemsize
        + jnp.dtype(valid2.dtype).itemsize)
    vmem_limit = int(min(max(4 * block_bytes, 16 * 1024 * 1024),
                         48 * 1024 * 1024))           # stays safe on v7x 64 MiB

    loss2 = pl.pallas_call(
        _rel_root_depth_loss_kernel,
        out_shape=jax.ShapeDtypeStruct((rows, _LANE), dtype),
        grid=grid,
        in_specs=[_spec(), _spec(), _spec()],
        out_specs=_spec(),
        compiler_params=pltpu.CompilerParams(
            dimension_semantics=("parallel",),
            vmem_limit_bytes=vmem_limit),
    )(out2, gt2, valid2)

    loss = loss2.reshape(-1)
    if padded != total:
        loss = loss[:total]
    return loss.reshape(orig_shape)


if __name__ == "__main__":
    # Case 1: typical root-depth layout — one scalar depth per sample, bool mask.
    key = jax.random.PRNGKey(0)
    k1, k2, k3 = jax.random.split(key, 3)
    B = 16
    d_out = jax.random.normal(k1, (B,), dtype=jnp.float32)
    d_gt = jax.random.normal(k2, (B,), dtype=jnp.float32)
    valid = jax.random.uniform(k3, (B,)) > 0.5                 # bool mask
    loss = jax.block_until_ready(rel_root_depth_loss(d_out, d_gt, valid))
    ref = jnp.abs(d_out - d_gt) * valid.astype(jnp.float32)
    assert loss.shape == ref.shape and loss.dtype == ref.dtype
    assert jnp.allclose(loss, ref, atol=1e-6), "case 1 mismatch"

    # Case 2: float mask + shape not a multiple of 128 (exercises padding path).
    k4, k5, k6 = jax.random.split(jax.random.PRNGKey(1), 3)
    d_out2 = jax.random.normal(k4, (5, 7), dtype=jnp.float32)
    d_gt2 = jax.random.normal(k5, (5, 7), dtype=jnp.float32)
    valid2 = (jax.random.uniform(k6, (5, 7)) > 0.3).astype(jnp.float32)
    loss2 = jax.block_until_ready(rel_root_depth_loss(d_out2, d_gt2, valid2))
    ref2 = jnp.abs(d_out2 - d_gt2) * valid2
    assert jnp.allclose(loss2, ref2, atol=1e-6), "case 2 mismatch"

    # Case 3: larger tensor to exercise a multi-step grid with a partial block.
    k7, k8, k9 = jax.random.split(jax.random.PRNGKey(2), 3)
    shape3 = (2, 300, 1000)
    d_out3 = jax.random.normal(k7, shape3, dtype=jnp.float32)
    d_gt3 = jax.random.normal(k8, shape3, dtype=jnp.float32)
    valid3 = jax.random.uniform(k9, shape3) > 0.5              # bool mask
    loss3 = jax.block_until_ready(rel_root_depth_loss(d_out3, d_gt3, valid3))
    ref3 = jnp.abs(d_out3 - d_gt3) * valid3.astype(jnp.float32)
    assert jnp.allclose(loss3, ref3, atol=1e-6), "case 3 mismatch"

    print("KERNEL_OK")
</pallas_src>

<mosaic_0001>
module attributes {stable_mosaic.version = 11 : i64} {
  func.func @_rel_root_depth_loss_kernel(%arg0: i32, %arg1: memref<1x128xf32, #tpu.memory_space<vmem>>, %arg2: memref<1x128xf32, #tpu.memory_space<vmem>>, %arg3: memref<1x128xi8, #tpu.memory_space<vmem>>, %arg4: memref<1x128xf32, #tpu.memory_space<vmem>>) attributes {dimension_semantics = [#tpu.dimension_semantics<parallel>], iteration_bounds = array<i64: 1>, scalar_prefetch = 0 : i64, scratch_operands = 0 : i64, tpu.core_type = #tpu.core_type<tc>, window_params = [{transform_indices = @transform_0, window_bounds = array<i64: 1, 128>}, {transform_indices = @transform_1, window_bounds = array<i64: 1, 128>}, {transform_indices = @transform_2, window_bounds = array<i64: 1, 128>}, {transform_indices = @transform_3, window_bounds = array<i64: 1, 128>}]} {
    %c0 = arith.constant 0 : index
    %c0_0 = arith.constant 0 : index
    %0 = vector.load %arg1[%c0, %c0_0] : memref<1x128xf32, #tpu.memory_space<vmem>>, vector<1x128xf32>
    %c0_1 = arith.constant 0 : index
    %c0_2 = arith.constant 0 : index
    %1 = vector.load %arg2[%c0_1, %c0_2] : memref<1x128xf32, #tpu.memory_space<vmem>>, vector<1x128xf32>
    %2 = arith.subf %0, %1 : vector<1x128xf32>
    %3 = math.absf %2 : vector<1x128xf32>
    %c0_3 = arith.constant 0 : index
    %c0_4 = arith.constant 0 : index
    %4 = vector.load %arg3[%c0_3, %c0_4] : memref<1x128xi8, #tpu.memory_space<vmem>>, vector<1x128xi8>
    %5 = arith.sitofp %4 : vector<1x128xi8> to vector<1x128xf32>
    %6 = arith.mulf %3, %5 : vector<1x128xf32>
    %c0_5 = arith.constant 0 : index
    %c0_6 = arith.constant 0 : index
    %7 = vector.load %arg4[%c0_5, %c0_6] : memref<1x128xf32, #tpu.memory_space<vmem>>, vector<1x128xf32>
    tpu.vector_store %arg4[%c0_5, %c0_6], %6 {strides = array<i32>} : memref<1x128xf32, #tpu.memory_space<vmem>>, vector<1x128xf32>,
    return
  }
  func.func @transform_0(%arg0: i32) -> (i32, i32) {
    %c0_i32 = arith.constant 0 : i32
    %c0_i32_0 = arith.constant 0 : i32
    return %arg0, %c0_i32 : i32, i32
  }
  func.func @transform_1(%arg0: i32) -> (i32, i32) {
    %c0_i32 = arith.constant 0 : i32
    %c0_i32_0 = arith.constant 0 : i32
    return %arg0, %c0_i32 : i32, i32
  }
  func.func @transform_2(%arg0: i32) -> (i32, i32) {
    %c0_i32 = arith.constant 0 : i32
    %c0_i32_0 = arith.constant 0 : i32
    return %arg0, %c0_i32 : i32, i32
  }
  func.func @transform_3(%arg0: i32) -> (i32, i32) {
    %c0_i32 = arith.constant 0 : i32
    %c0_i32_0 = arith.constant 0 : i32
    return %arg0, %c0_i32 : i32, i32
  }
}

</mosaic_0001>

<bundles_post_ra>
// kernel: tpu_custom_call.1
= control target key start
LH: loop header
LB: loop body
LE: loop exit
PB: predicated region body
PF: predicated region fallthrough
CT: control target
= control target key end

     0   :  { %8 = vsyncpa [#allocation3], 0  ;;  %s153_s0 = inlined_call_operand.hbm [shape: f32[1,128], index: 0, kind: input, shape index: {}]   ;;  %s154_s1 = inlined_call_operand.vmem [shape: f32[1,128], index: 1, kind: input, shape index: {}]   ;;  %s155_s2 = inlined_call_operand.vmem [shape: s8[1,128], index: 2, kind: input, shape index: {}]   ;;  %s156_s3 = inlined_call_operand.hbm [shape: f32[1,128], index: 3, kind: output, shape index: {}]  }
   0x1   :  { %9 = vsyncpa [#allocation4], 0  ;;  %s101_s12 = smov [#allocation2]   ;;  %s53_s16 = scalar_lea.hbm %s153_s0, 16 }
   0x2   :  { %s16_s13 = sshll.u32 %s101_s12, 4  ;;  %p54_p0 = scmp.ne.s32.totalorder %s153_s0, %s53_s16  ;;  %s17_s13 = int_to_ptr.vmem [resolvable:$true] %s16_s13 }
   0x3   :  { %p57_p1 = scmp.lt.u32.totalorder %s53_s16, %s153_s0 }
   0x5   :  { %p59_p2 = pnand %p57_p1, %p54_p0 }
   0x7   :  { %62 = shalt.err (!%p59_p2)
}
   0x8   :  { %s63_s21 = scalar_lea.vmem %s17_s13, 16  ;;  %s67_s22 = scalar_lea.vmem %s17_s13, 32 }
   0x9   :  { %p64_p3 = scmp.ne.s32.totalorder %s17_s13, %s63_s21  ;;  %p68_p4 = scmp.lt.s32.totalorder %s17_s13, %s17_s13 }
   0xa   :  { %p69_p5 = scmp.lt.s32.totalorder %s67_s22, %s63_s21 }
   0xc   :  { %p70_p6 = por %p69_p5, %p68_p4 }
   0xe   :  { %p71_p7 = pnand %p70_p6, %p64_p3 }
  0x10   :  { %74 = shalt.err (!%p71_p7)
}
  0x11   :  { %19 = dma.hbm_to_vmem [thread:$0]  %s153_s0, 16, %s17_s13, [#allocation3]  }
  0x12   :  { %97 = dma.done.wait [#allocation3], 16  }
  0x13   :  { %98 = vsyncadd [#allocation3], 4294967280  ;;  %v27_v0 = vld [vmem:[#allocation2] sm:$0x1]  ;;  %s102_s29 = smov [#allocation5]  }
  0x14   :  { %v28_v1 = vld [vmem:[%s154_s1] sm:$0x1]  ;;  %s42_s30 = sshll.u32 %s102_s29, 4  ;;  %s43_s30 = int_to_ptr.vmem [resolvable:$true] %s42_s30 }
  0x15   :  { %v31_v2 = vld [vmem:[%s155_s2] sm:$0x1]  ;;  %v29_v3 = vsub.f32 %v27_v0, %v28_v1  ;;  %s75_s0 = scalar_lea.vmem %s43_s30, 16  ;;  %s79_s4 = scalar_lea.vmem %s43_s30, 32 }
  0x16   :  { %v32_v4 = vunpack.c.0.s8 %v31_v2  ;;  %p76_p8 = scmp.ne.s32.totalorder %s43_s30, %s75_s0  ;;  %p80_p9 = scmp.lt.s32.totalorder %s43_s30, %s43_s30 }
  0x17   :  { %v30_v5 = vand.u32 2147483647, %v29_v3  ;;  %p81_p10 = scmp.lt.s32.totalorder %s79_s4, %s75_s0 }
  0x18   :  { %v33_v6 = vcvt.s32.f32 %v32_v4 }
  0x19   :  { %p82_p11 = por %p81_p10, %p80_p9 }
  0x1a   :  { %v34_v7 = vmul.f32 %v33_v6, %v30_v5 }
  0x1b   :  { %p83_p12 = pnand %p82_p11, %p76_p8 }
  0x1c   :  { %35 = vst [vmem:[#allocation5] sm:$0x1] %v34_v7 }
  0x1d   :  { %86 = shalt.err (!%p83_p12)
}
  0x1e   :  { %s87_s2 = scalar_lea.hbm %s156_s3, 16 }
  0x1f   :  { %p88_p13 = scmp.ne.s32.totalorder %s156_s3, %s87_s2  ;;  %p91_p0 = scmp.lt.u32.totalorder %s87_s2, %s156_s3 }
  0x21   :  { %p93_p1 = pnand %p91_p0, %p88_p13 }
  0x23   :  { %96 = shalt.err (!%p93_p1)
}
  0x24   :  { %45 = dma.vmem_to_hbm [thread:$0]  %s43_s30, 16, %s156_s3, [#allocation4]  }
  0x25   :  { %99 = dma.done.wait [#allocation4], 16  }
  0x26   :  { %100 = vsyncadd [#allocation4], 4294967280 }
  0x27   :  { %49 = vsyncpa [#allocation3], 1 }
  0x28   :  { %50 = vsyncpa [#allocation4], 1 }

</bundles_post_ra>
